<compile_context>
chip_gen: v7x
topology: tpu7x:2x2x1
jax: 0.10.0
libtpu: 0.0.40
codegen_flags: <defaults>
</compile_context>

<pallas_src>
import functools

import jax
import jax.numpy as jnp
from jax.experimental import pallas as pl
from jax.experimental.pallas import tpu as pltpu

IN_FEATURES = 784
HIDDEN = 400
OUT = 10
HIDDEN_PAD = 512   # 400 -> 4 * 128 lanes (clean MXU/VPU tiles)
OUT_PAD = 128      # 10  -> 128 lanes (lane-dense output stores, no vst.msk)


def _round_up(n, m):
    return pl.cdiv(n, m) * m


def _has_bf16_vpu():
    """True on TPU generations with a bf16 VPU path (v6e and newer)."""
    try:
        kind = jax.devices()[0].device_kind.lower()
    except Exception:
        return False
    return not any(g in kind for g in ("v2", "v3", "v4", "v5"))


def vae_forward_kernel(x_ref, w1_ref, w2_ref, out_ref, *, relu_in_bf16):
    """Fused MLP hot path for one batch tile: relu(x @ w1) @ w2.

    x_ref  : (TB, 784)   f32   (cast to bf16 here, not in the wrapper)
    w1_ref : (784, 512)  bf16  (zero-padded, VMEM-resident across grid steps)
    w2_ref : (512, 128)  bf16  (zero-padded, VMEM-resident across grid steps)
    out_ref: (TB, 128)   f32   (sliced back to (B, 10) in the wrapper)
    """
    # Cast x on the VPU (VALU has slack); HBM only ever sees f32 x once.
    x_bf = x_ref[...].astype(jnp.bfloat16)
    # First matmul on the MXU (bf16 inputs, f32 accumulation).
    h1 = jnp.dot(x_bf, w1_ref[...], preferred_element_type=jnp.float32)
    if relu_in_bf16:
        # v6e/v7x: ReLU on packed bf16 vregs (half the VALU ops and bytes).
        h1_bf = jnp.maximum(h1.astype(jnp.bfloat16), 0.0)
    else:
        # v5e and older: no bf16 VPU; ReLU in f32, cast only at the MXU input.
        h1_bf = jnp.maximum(h1, 0.0).astype(jnp.bfloat16)
    # Second matmul on the MXU, f32 accumulation, lane-dense f32 store.
    out_ref[...] = jnp.dot(h1_bf, w2_ref[...], preferred_element_type=jnp.float32)


def prepare_weights(w1, w2):
    """One-time weight prep (hoisted out of the per-forward path).

    Zero-pads hidden 400->512 and output 10->128 (exact through ReLU and the
    second matmul) and casts to bf16 (MXU-native, halves weight DMA bytes).
    """
    w1p = jnp.zeros((IN_FEATURES, HIDDEN_PAD), jnp.float32).at[:, :HIDDEN].set(w1)
    w2p = jnp.zeros((HIDDEN_PAD, OUT_PAD), jnp.float32).at[:HIDDEN, :OUT].set(w2)
    return w1p.astype(jnp.bfloat16), w2p.astype(jnp.bfloat16)


def vae_forward(x_nchw, w1_bf, w2_bf, *, tile_b=1024):
    """Forward pass.  `w1_bf` / `w2_bf` are the outputs of prepare_weights()."""
    assert tile_b % 16 == 0, "tile_b must be a multiple of 16 (bf16 sublane packing)"
    b = x_nchw.shape[0]
    x = x_nchw.reshape(b, IN_FEATURES)
    if x.dtype != jnp.float32:
        x = x.astype(jnp.float32)

    # Balanced batch tiling: tile is a multiple of 16, <= tile_b, sized so the
    # grid has cdiv(b, tile_b) steps with minimal padding waste.  For moderate
    # batches force >= 2 steps so both v7x TensorCores get work (the batch axis
    # is "parallel"); v5e/v6e are unaffected beyond ~0.35 us extra step overhead.
    n_steps = pl.cdiv(b, tile_b)
    if b >= 32:
        n_steps = max(n_steps, 2)
    tb = _round_up(pl.cdiv(b, n_steps), 16)
    b_pad = _round_up(b, tb)
    if b_pad != b:
        # Zero rows are exact and sliced off below (only hit when b % tb != 0).
        x = jnp.pad(x, ((0, b_pad - b), (0, 0)))

    out_full = pl.pallas_call(
        functools.partial(vae_forward_kernel, relu_in_bf16=_has_bf16_vpu()),
        out_shape=jax.ShapeDtypeStruct((b_pad, OUT_PAD), jnp.float32),
        grid_spec=pl.GridSpec(
            grid=(b_pad // tb,),
            in_specs=[
                # x: one batch tile per grid step (software-pipelined f32 DMA).
                pl.BlockSpec((tb, IN_FEATURES), lambda i: (i, 0)),
                # Weights: constant index_map -> fetched once, VMEM-resident.
                pl.BlockSpec((IN_FEATURES, HIDDEN_PAD), lambda i: (0, 0)),
                pl.BlockSpec((HIDDEN_PAD, OUT_PAD), lambda i: (0, 0)),
            ],
            out_specs=pl.BlockSpec((tb, OUT_PAD), lambda i: (i, 0)),
        ),
        compiler_params=pltpu.CompilerParams(
            # Independent batch axis -> shardable across v7x's 2 TensorCores.
            dimension_semantics=("parallel",),
            # ~14 MiB at tb=1024 (x 2x3.1 MiB f32, h1 ~3 MiB, out 2x0.5 MiB,
            # weights ~2 MiB); 32 MiB is safe on every generation (v7x incl.).
            vmem_limit_bytes=32 * 1024 * 1024,
        ),
    )(x, w1_bf, w2_bf)

    # Slice away batch and lane padding.
    return out_full[:b, :OUT]


def reference_forward_f32(x_nchw, w1, w2):
    x = x_nchw.reshape(x_nchw.shape[0], IN_FEATURES).astype(jnp.float32)
    h1 = jnp.maximum(x @ w1, 0.0)
    return h1 @ w2


def reference_forward_bf16_path(x_nchw, w1, w2):
    """Mirrors the kernel's bf16-input / f32-accumulate data path."""
    x = x_nchw.reshape(x_nchw.shape[0], IN_FEATURES).astype(jnp.bfloat16)
    h1 = jnp.dot(x, w1.astype(jnp.bfloat16), preferred_element_type=jnp.float32)
    h1 = jnp.maximum(h1, 0.0)
    return jnp.dot(h1.astype(jnp.bfloat16), w2.astype(jnp.bfloat16),
                   preferred_element_type=jnp.float32)


if __name__ == "__main__":
    key = jax.random.PRNGKey(0)
    k_x, k_w1, k_w2 = jax.random.split(key, 3)

    # Small MNIST-like batch: (B, C, H, W) = (2, 1, 28, 28) -> flattens to (2, 784).
    x = jax.random.normal(k_x, (2, 1, 28, 28), dtype=jnp.float32)

    # Deterministic parameter init matching p.data.uniform_(-0.25, 0.25).
    w1 = jax.random.uniform(k_w1, (784, 400), jnp.float32, minval=-0.25, maxval=0.25)
    w2 = jax.random.uniform(k_w2, (400, 10), jnp.float32, minval=-0.25, maxval=0.25)

    # One-time weight prep ("model init"), then the per-call forward.
    w1_bf, w2_bf = prepare_weights(w1, w2)
    out = vae_forward(x, w1_bf, w2_bf)
    out = jax.block_until_ready(out)
    assert out.shape == (2, 10), out.shape

    # Tight check against a reference that uses the same bf16-in / f32-acc path.
    ref_bf = reference_forward_bf16_path(x, w1, w2)
    assert jnp.allclose(out, ref_bf, atol=1e-2, rtol=1e-2), "mismatch vs bf16-path reference"

    # Loose check against the exact f32 PyTorch semantics (bf16 rounding only).
    ref_f32 = reference_forward_f32(x, w1, w2)
    assert jnp.allclose(out, ref_f32, atol=0.5, rtol=5e-2), "mismatch vs f32 reference"

    # TODO(synk): nn.Softmax is constructed in the module but never applied in
    # forward(); intentionally omitted to match the PyTorch forward pass.
    print("KERNEL_OK")
</pallas_src>

<mosaic_0001>
module attributes {stable_mosaic.version = 11 : i64} {
  func.func @vae_forward_kernel(%arg0: i32, %arg1: memref<16x784xf32, #tpu.memory_space<vmem>>, %arg2: memref<784x512xbf16, #tpu.memory_space<vmem>>, %arg3: memref<512x128xbf16, #tpu.memory_space<vmem>>, %arg4: memref<16x128xf32, #tpu.memory_space<vmem>>) attributes {dimension_semantics = [#tpu.dimension_semantics<parallel>], iteration_bounds = array<i64: 1>, scalar_prefetch = 0 : i64, scratch_operands = 0 : i64, tpu.core_type = #tpu.core_type<tc>, window_params = [{transform_indices = @transform_0, window_bounds = array<i64: 16, 784>}, {pipeline_mode = #tpu.pipeline_mode<synchronous>, transform_indices = @transform_1, window_bounds = array<i64: 784, 512>}, {pipeline_mode = #tpu.pipeline_mode<synchronous>, transform_indices = @transform_2, window_bounds = array<i64: 512, 128>}, {transform_indices = @transform_3, window_bounds = array<i64: 16, 128>}]} {
    %c0 = arith.constant 0 : index
    %c0_0 = arith.constant 0 : index
    %0 = vector.load %arg1[%c0, %c0_0] : memref<16x784xf32, #tpu.memory_space<vmem>>, vector<16x784xf32>
    %1 = arith.truncf %0 : vector<16x784xf32> to vector<16x784xbf16>
    %c0_1 = arith.constant 0 : index
    %c0_2 = arith.constant 0 : index
    %2 = vector.load %arg2[%c0_1, %c0_2] : memref<784x512xbf16, #tpu.memory_space<vmem>>, vector<784x512xbf16>
    %cst = arith.constant dense<0.000000e+00> : vector<16x512xf32>
    %3 = tpu.matmul %1, %2, %cst {dimension_numbers = #tpu.dot_dimension_numbers<[1], [0], [0], [1], [0, 0, 1, 1], [], []>} : vector<16x784xbf16>, vector<784x512xbf16>, vector<16x512xf32> -> vector<16x512xf32>
    %4 = arith.truncf %3 : vector<16x512xf32> to vector<16x512xbf16>
    %cst_3 = arith.constant 0.000000e+00 : bf16
    %5 = vector.broadcast %cst_3 : bf16 to vector<16x512xbf16>
    %6 = arith.maximumf %4, %5 : vector<16x512xbf16>
    %c0_4 = arith.constant 0 : index
    %c0_5 = arith.constant 0 : index
    %7 = vector.load %arg3[%c0_4, %c0_5] : memref<512x128xbf16, #tpu.memory_space<vmem>>, vector<512x128xbf16>
    %cst_6 = arith.constant dense<0.000000e+00> : vector<16x128xf32>
    %8 = tpu.matmul %6, %7, %cst_6 {dimension_numbers = #tpu.dot_dimension_numbers<[1], [0], [0], [1], [0, 0, 1, 1], [], []>} : vector<16x512xbf16>, vector<512x128xbf16>, vector<16x128xf32> -> vector<16x128xf32>
    %c0_7 = arith.constant 0 : index
    %c0_8 = arith.constant 0 : index
    %9 = vector.load %arg4[%c0_7, %c0_8] : memref<16x128xf32, #tpu.memory_space<vmem>>, vector<16x128xf32>
    tpu.vector_store %arg4[%c0_7, %c0_8], %8 {strides = array<i32>} : memref<16x128xf32, #tpu.memory_space<vmem>>, vector<16x128xf32>,
    return
  }
  func.func @transform_0(%arg0: i32) -> (i32, i32) {
    %c0_i32 = arith.constant 0 : i32
    %c0_i32_0 = arith.constant 0 : i32
    return %arg0, %c0_i32 : i32, i32
  }
  func.func @transform_1(%arg0: i32) -> (i32, i32) {
    %c0_i32 = arith.constant 0 : i32
    %c0_i32_0 = arith.constant 0 : i32
    %c0_i32_1 = arith.constant 0 : i32
    return %c0_i32, %c0_i32_0 : i32, i32
  }
  func.func @transform_2(%arg0: i32) -> (i32, i32) {
    %c0_i32 = arith.constant 0 : i32
    %c0_i32_0 = arith.constant 0 : i32
    %c0_i32_1 = arith.constant 0 : i32
    return %c0_i32, %c0_i32_0 : i32, i32
  }
  func.func @transform_3(%arg0: i32) -> (i32, i32) {
    %c0_i32 = arith.constant 0 : i32
    %c0_i32_0 = arith.constant 0 : i32
    return %arg0, %c0_i32 : i32, i32
  }
}

</mosaic_0001>

<bundles_post_ra>
// kernel: tpu_custom_call.1
= control target key start
LH: loop header
LB: loop body
LE: loop exit
PB: predicated region body
PF: predicated region fallthrough
CT: control target
= control target key end

     0   :  { %8 = vsyncpa [#allocation3], 0  ;;  %s2786_s0 = inlined_call_operand.hbm [shape: f32[16,784], index: 0, kind: input, shape index: {}]   ;;  %s2787_s1 = inlined_call_operand.hbm [shape: bf16[784,512], index: 1, kind: input, shape index: {}]   ;;  %s2788_s2 = inlined_call_operand.hbm [shape: bf16[512,128], index: 2, kind: input, shape index: {}]   ;;  %s2789_s3 = inlined_call_operand.hbm [shape: f32[16,128], index: 3, kind: output, shape index: {}]  }
   0x1   :  { %9 = vsyncpa [#allocation6], 0 }
   0x2   :  { %10 = vsyncpa [#allocation4], 0  ;;  %s2699_s12 = smov [#allocation5]   ;;  %s2605_s16 = scalar_lea.hbm %s2787_s1, 25088 }
   0x3   :  { %s28_s13 = sshll.u32 %s2699_s12, 4  ;;  %p2606_p0 = scmp.ne.s32.totalorder %s2787_s1, %s2605_s16  ;;  %s29_s13 = int_to_ptr.vmem [resolvable:$true] %s28_s13 }
   0x4   :  { %p2609_p1 = scmp.lt.u32.totalorder %s2605_s16, %s2787_s1 }
   0x6   :  { %p2611_p2 = pnand %p2609_p1, %p2606_p0 }
   0x8   :  { %2614 = shalt.err (!%p2611_p2)
}
   0x9   :  { %s2615_s21 = scalar_lea.vmem %s29_s13, 25088  ;;  %p2620_p4 = scmp.lt.s32.totalorder %s29_s13, %s29_s13 }
   0xa   :  { %p2616_p3 = scmp.ne.s32.totalorder %s29_s13, %s2615_s21  ;;  %p2621_p5 = scmp.lt.s32.totalorder %s2615_s21, %s2615_s21 }
   0xc   :  { %p2622_p6 = por %p2621_p5, %p2620_p4 }
   0xe   :  { %p2623_p7 = pnand %p2622_p6, %p2616_p3 }
  0x10   :  { %2626 = shalt.err (!%p2623_p7)
}
  0x11   :  { %s2700_s22 = smov 256   ;;  %s2701_s23 = smov 16  }
  0x12   :  { %34 = dma.hbm_to_vmem [thread:$0]  %s2787_s1, 25088, %s29_s13, [#allocation6], %s2700_s22, %s2700_s22, %s2701_s23  }
  0x13   :  { %s2702_s26 = smov [#allocation2]   ;;  %s2627_s30 = scalar_lea.hbm %s2786_s0, 1792 }
  0x14   :  { %s16_s27 = sshll.u32 %s2702_s26, 4  ;;  %p2628_p8 = scmp.ne.s32.totalorder %s2786_s0, %s2627_s30  ;;  %s17_s27 = int_to_ptr.vmem [resolvable:$true] %s16_s27 }
  0x15   :  { %p2631_p9 = scmp.lt.u32.totalorder %s2627_s30, %s2786_s0 }
  0x17   :  { %p2633_p10 = pnand %p2631_p9, %p2628_p8 }
  0x19   :  { %2636 = shalt.err (!%p2633_p10)
}
  0x1a   :  { %s2637_s8 = scalar_lea.vmem %s17_s27, 1792  ;;  %p2642_p12 = scmp.lt.s32.totalorder %s17_s27, %s17_s27 }
  0x1b   :  { %p2638_p11 = scmp.ne.s32.totalorder %s17_s27, %s2637_s8  ;;  %p2643_p13 = scmp.lt.s32.totalorder %s2637_s8, %s2637_s8 }
  0x1d   :  { %p2644_p0 = por %p2643_p13, %p2642_p12 }
  0x1f   :  { %p2645_p1 = pnand %p2644_p0, %p2638_p11 }
  0x21   :  { %2648 = shalt.err (!%p2645_p1)
}
  0x22   :  { %s2703_s1 = smov 896   ;;  %s2704_s9 = smov 56  }
  0x23   :  { %22 = dma.hbm_to_vmem [thread:$0]  %s2786_s0, 1792, %s17_s27, [#allocation3], %s2703_s1, %s2703_s1, %s2704_s9  }
  0x24   :  { %s2705_s12 = smov [#allocation7]   ;;  %s2649_s16 = scalar_lea.hbm %s2788_s2, 4096 }
  0x25   :  { %s40_s13 = sshll.u32 %s2705_s12, 4  ;;  %p2650_p2 = scmp.ne.s32.totalorder %s2788_s2, %s2649_s16  ;;  %s41_s13 = int_to_ptr.vmem [resolvable:$true] %s40_s13 }
  0x26   :  { %p2653_p3 = scmp.lt.u32.totalorder %s2649_s16, %s2788_s2 }
  0x28   :  { %p2655_p4 = pnand %p2653_p3, %p2650_p2 }
  0x2a   :  { %2658 = shalt.err (!%p2655_p4)
}
  0x2b   :  { %s2659_s21 = scalar_lea.vmem %s41_s13, 4096  ;;  %p2664_p6 = scmp.lt.s32.totalorder %s41_s13, %s41_s13 }
  0x2c   :  { %p2660_p5 = scmp.ne.s32.totalorder %s41_s13, %s2659_s21  ;;  %p2665_p7 = scmp.lt.s32.totalorder %s2659_s21, %s2659_s21 }
  0x2e   :  { %p2666_p8 = por %p2665_p7, %p2664_p6 }
  0x30   :  { %p2667_p9 = pnand %p2666_p8, %p2660_p5 }
  0x32   :  { %2670 = shalt.err (!%p2667_p9)
}
  0x33   :  { %s2706_s0 = smov 64   ;;  %s2707_s22 = smov 4  }
  0x34   :  { %46 = dma.hbm_to_vmem [thread:$0]  %s2788_s2, 4096, %s41_s13, [#allocation6], %s2706_s0, %s2706_s0, %s2707_s22  }
  0x35   :  { %2693 = dma.done.wait [#allocation3], 1792  }
  0x36   :  { %2694 = vsyncadd [#allocation3], 4294965504 }
  0x37   :  { %2695 = dma.done.wait [#allocation6], 29184  }
  0x38   :  { %2696 = vsyncadd [#allocation6], 4294938112  ;;  %v2279_v0 = vld [vmem:[#allocation5 + $0x4] ss:$16 sps:$4 sm:$0xff]   ;;  %v2281_v1 = vld [vmem:[#allocation5 + $0xc] ss:$16 sps:$4 sm:$0xff]  }
  0x39   :  { %1258 = vmatprep.subr.bf16.mxu0 %v2279_v0  ;;  %v2283_v2 = vld [vmem:[#allocation5] ss:$16 sps:$4 sm:$0xff]   ;;  %v2284_v3 = vld [vmem:[#allocation5 + $0x8] ss:$16 sps:$4 sm:$0xff]   ;;  %1430 = vmatprep.subr.bf16.mxu1 %v2281_v1  ;;  %v2285_v4 = vld [vmem:[#allocation5 + $0x24] ss:$16 sps:$4 sm:$0xff]  }
  0x3a   :  { %1259 = vmatpush1.bf16.msra.mxu0 %v2283_v2  ;;  %1431 = vmatpush1.bf16.msra.mxu1 %v2284_v3  ;;  %v2287_v5 = vld [vmem:[#allocation5 + $0x2c] ss:$16 sps:$4 sm:$0xff]   ;;  %v2289_v6 = vld [vmem:[#allocation5 + $0x20] ss:$16 sps:$4 sm:$0xff]   ;;  %v2290_v7 = vld [vmem:[#allocation5 + $0x28] ss:$16 sps:$4 sm:$0xff]  }
  0x3b   :  { %1260 = vmatprep.subr.bf16.mxu0 %v2285_v4  ;;  %1432 = vmatprep.subr.bf16.mxu1 %v2287_v5  ;;  %v2291_v8 = vld [vmem:[#allocation5 + $0x44] ss:$16 sps:$4 sm:$0xff]   ;;  %v2293_v9 = vld [vmem:[#allocation5 + $0x4c] ss:$16 sps:$4 sm:$0xff]   ;;  %v2295_v10 = vld [vmem:[#allocation5 + $0x40] ss:$16 sps:$4 sm:$0xff]  }
  0x3c   :  { %v2296_v11 = vld [vmem:[#allocation5 + $0x48] ss:$16 sps:$4 sm:$0xff]   ;;  %v2297_v12 = vld [vmem:[#allocation5 + $0x64] ss:$16 sps:$4 sm:$0xff]   ;;  %v2299_v13 = vld [vmem:[#allocation5 + $0x6c] ss:$16 sps:$4 sm:$0xff]  }
  0x3d   :  { %v2301_v14 = vld [vmem:[#allocation5 + $0x60] ss:$16 sps:$4 sm:$0xff]   ;;  %v2302_v15 = vld [vmem:[#allocation5 + $0x68] ss:$16 sps:$4 sm:$0xff]   ;;  %v2303_v16 = vld [vmem:[#allocation5 + $0x84] ss:$16 sps:$4 sm:$0xff]  }
  0x3e   :  { %1261 = vmatpush1.bf16.msra.mxu0 %v2289_v6  ;;  %1433 = vmatpush1.bf16.msra.mxu1 %v2290_v7  ;;  %v2305_v17 = vld [vmem:[#allocation5 + $0x8c] ss:$16 sps:$4 sm:$0xff]   ;;  %v2307_v18 = vld [vmem:[#allocation5 + $0x80] ss:$16 sps:$4 sm:$0xff]   ;;  %v2308_v19 = vld [vmem:[#allocation5 + $0x88] ss:$16 sps:$4 sm:$0xff]  }
  0x3f   :  { %1262 = vmatprep.subr.bf16.mxu0 %v2291_v8  ;;  %1434 = vmatprep.subr.bf16.mxu1 %v2293_v9  ;;  %v2309_v20 = vld [vmem:[#allocation5 + $0xa4] ss:$16 sps:$4 sm:$0xff]   ;;  %v2311_v21 = vld [vmem:[#allocation5 + $0xac] ss:$16 sps:$4 sm:$0xff]   ;;  %v2313_v22 = vld [vmem:[#allocation5 + $0xa0] ss:$16 sps:$4 sm:$0xff]  }
  0x40   :  { %v2314_v23 = vld [vmem:[#allocation5 + $0xa8] ss:$16 sps:$4 sm:$0xff]   ;;  %v2315_v24 = vld [vmem:[#allocation5 + $0xc4] ss:$16 sps:$4 sm:$0xff]   ;;  %v2317_v25 = vld [vmem:[#allocation5 + $0xcc] ss:$16 sps:$4 sm:$0xff]  }
  0x41   :  { %v2319_v26 = vld [vmem:[#allocation5 + $0xc0] ss:$16 sps:$4 sm:$0xff]   ;;  %v2320_v27 = vld [vmem:[#allocation5 + $0xc8] ss:$16 sps:$4 sm:$0xff]   ;;  %v2321_v28 = vld [vmem:[#allocation5 + $0xe4] ss:$16 sps:$4 sm:$0xff]  }
  0x42   :  { %1263 = vmatpush1.bf16.msra.mxu0 %v2295_v10  ;;  %1435 = vmatpush1.bf16.msra.mxu1 %v2296_v11  ;;  %v2323_v29 = vld [vmem:[#allocation5 + $0xec] ss:$16 sps:$4 sm:$0xff]   ;;  %v2325_v30 = vld [vmem:[#allocation5 + $0xe0] ss:$16 sps:$4 sm:$0xff]   ;;  %v2326_v31 = vld [vmem:[#allocation5 + $0xe8] ss:$16 sps:$4 sm:$0xff]  }
  0x43   :  { %1264 = vmatprep.subr.bf16.mxu0 %v2297_v12  ;;  %1436 = vmatprep.subr.bf16.mxu1 %v2299_v13  ;;  %v2327_v32 = vld [vmem:[#allocation5 + $0x104] ss:$16 sps:$4 sm:$0xff]   ;;  %v2329_v33 = vld [vmem:[#allocation5 + $0x10c] ss:$16 sps:$4 sm:$0xff]   ;;  %v2331_v34 = vld [vmem:[#allocation5 + $0x100] ss:$16 sps:$4 sm:$0xff]  }
  0x44   :  { %v2332_v35 = vld [vmem:[#allocation5 + $0x108] ss:$16 sps:$4 sm:$0xff]   ;;  %v2333_v36 = vld [vmem:[#allocation5 + $0x124] ss:$16 sps:$4 sm:$0xff]   ;;  %v2335_v37 = vld [vmem:[#allocation5 + $0x12c] ss:$16 sps:$4 sm:$0xff]  }
  0x45   :  { %v2337_v38 = vld [vmem:[#allocation5 + $0x120] ss:$16 sps:$4 sm:$0xff]   ;;  %v2338_v39 = vld [vmem:[#allocation5 + $0x128] ss:$16 sps:$4 sm:$0xff]   ;;  %v2339_v40 = vld [vmem:[#allocation5 + $0x144] ss:$16 sps:$4 sm:$0xff]  }
  0x46   :  { %1265 = vmatpush1.bf16.msra.mxu0 %v2301_v14  ;;  %1437 = vmatpush1.bf16.msra.mxu1 %v2302_v15  ;;  %v2341_v41 = vld [vmem:[#allocation5 + $0x14c] ss:$16 sps:$4 sm:$0xff]   ;;  %v2343_v42 = vld [vmem:[#allocation5 + $0x140] ss:$16 sps:$4 sm:$0xff]   ;;  %v2344_v43 = vld [vmem:[#allocation5 + $0x148] ss:$16 sps:$4 sm:$0xff]  }
  0x47   :  { %1266 = vmatprep.subr.bf16.mxu0 %v2303_v16  ;;  %1438 = vmatprep.subr.bf16.mxu1 %v2305_v17  ;;  %v2345_v44 = vld [vmem:[#allocation5 + $0x164] ss:$16 sps:$4 sm:$0xff]   ;;  %v2347_v45 = vld [vmem:[#allocation5 + $0x16c] ss:$16 sps:$4 sm:$0xff]   ;;  %v2349_v48 = vld [vmem:[#allocation5 + $0x160] ss:$16 sps:$4 sm:$0xff]  }
  0x48   :  { %v58_v46 = vld [vmem:[#allocation2 + $0x8] sm:$0xff]  ;;  %v65_v47 = vld [vmem:[#allocation2 + $0x40] sm:$0xff]  ;;  %v64_v5 = vld [vmem:[#allocation2 + $0x38] sm:$0xff]  ;;  %vm1254_vm0 = vcmask 130048   ;;  %s2709_s2 = smov [#allocation8]  }
  0x49   :  { %v2350_v49 = vld [vmem:[#allocation5 + $0x168] ss:$16 sps:$4 sm:$0xff]   ;;  %v72_v50 = vpack.c.bf16 %v65_v47, %v58_v46  ;;  %v2351_v51 = vld [vmem:[#allocation5 + $0x184] ss:$16 sps:$4 sm:$0xff]   ;;  %v2353_v52 = vld [vmem:[#allocation5 + $0x18c] ss:$16 sps:$4 sm:$0xff]  }
  0x4a   :  { %1267 = vmatpush1.bf16.msra.mxu0 %v2307_v18  ;;  %1439 = vmatpush1.bf16.msra.mxu1 %v2308_v19  ;;  %v2355_v53 = vld [vmem:[#allocation5 + $0x180] ss:$16 sps:$4 sm:$0xff]   ;;  %v2356_v54 = vld [vmem:[#allocation5 + $0x188] ss:$16 sps:$4 sm:$0xff]   ;;  %v2357_v55 = vld [vmem:[#allocation5 + $0x1a4] ss:$16 sps:$4 sm:$0xff]  }
  0x4b   :  { %1268 = vmatprep.subr.bf16.mxu0 %v2309_v20  ;;  %1440 = vmatprep.subr.bf16.mxu1 %v2311_v21  ;;  %v2359_v56 = vld [vmem:[#allocation5 + $0x1ac] ss:$16 sps:$4 sm:$0xff]   ;;  %v2361_v57 = vld [vmem:[#allocation5 + $0x1a0] ss:$16 sps:$4 sm:$0xff]   ;;  %v2362_v58 = vld [vmem:[#allocation5 + $0x1a8] ss:$16 sps:$4 sm:$0xff]  }
  0x4c   :  { %1290 = vmatprep.mubr.bf16.mxu0 %v72_v50  ;;  %1462 = vmatprep.mubr.bf16.mxu1 %v72_v50  ;;  %v2363_v59 = vld [vmem:[#allocation5 + $0x1c4] ss:$16 sps:$4 sm:$0xff]   ;;  %v2365_v60 = vld [vmem:[#allocation5 + $0x1cc] ss:$16 sps:$4 sm:$0xff]   ;;  %v2367_v61 = vld [vmem:[#allocation5 + $0x1c0] ss:$16 sps:$4 sm:$0xff]  }
  0x4d   :  { %v2368_v62 = vld [vmem:[#allocation5 + $0x1c8] ss:$16 sps:$4 sm:$0xff]   ;;  %v2369_v63 = vld [vmem:[#allocation5 + $0x1e4] ss:$16 sps:$4 sm:$0xff]   ;;  %v2371_v0 = vld [vmem:[#allocation5 + $0x1ec] ss:$16 sps:$4 sm:$0xff]  }
  0x4e   :  { %1269 = vmatpush1.bf16.msra.mxu0 %v2313_v22  ;;  %1441 = vmatpush1.bf16.msra.mxu1 %v2314_v23  ;;  %v2373_v1 = vld [vmem:[#allocation5 + $0x1e0] ss:$16 sps:$4 sm:$0xff]   ;;  %v2374_v2 = vld [vmem:[#allocation5 + $0x1e8] ss:$16 sps:$4 sm:$0xff]   ;;  %v2377_v3 = vld [vmem:[#allocation5 + $0x204] ss:$16 sps:$4 sm:$0xff]  }
  0x4f   :  { %1270 = vmatprep.subr.bf16.mxu0 %v2315_v24  ;;  %1442 = vmatprep.subr.bf16.mxu1 %v2317_v25  ;;  %v57_v4 = vld [vmem:[#allocation2] sm:$0xff]  ;;  %v2380_v6 = vld [vmem:[#allocation5 + $0x20c] ss:$16 sps:$4 sm:$0xff]   ;;  %v2378_v8 = vld [vmem:[#allocation5 + $0x208] ss:$16 sps:$4 sm:$0xff]   ;;  %s1955_s25 = sshll.u32 %s2709_s2, 4  ;;  %s1956_s25 = int_to_ptr.vmem [resolvable:$true] %s1955_s25 }
  0x50   :  { %v2375_v7 = vld [vmem:[#allocation5 + $0x200] ss:$16 sps:$4 sm:$0xff]   ;;  %v71_v9 = vpack.c.bf16 %v64_v5, %v57_v4  ;;  %v2383_v10 = vld [vmem:[#allocation5 + $0x224] ss:$16 sps:$4 sm:$0xff]   ;;  %v2386_v11 = vld [vmem:[#allocation5 + $0x22c] ss:$16 sps:$4 sm:$0xff]   ;;  %p2676_p11 = scmp.lt.s32.totalorder %s1956_s25, %s1956_s25 }
  0x51   :  { %v2381_v12 = vld [vmem:[#allocation5 + $0x220] ss:$16 sps:$4 sm:$0xff]   ;;  %v2384_v13 = vld [vmem:[#allocation5 + $0x228] ss:$16 sps:$4 sm:$0xff]   ;;  %v2389_v14 = vld [vmem:[#allocation5 + $0x244] ss:$16 sps:$4 sm:$0xff]  }
  0x52   :  { %1271 = vmatpush1.bf16.msra.mxu0 %v2319_v26  ;;  %1443 = vmatpush1.bf16.msra.mxu1 %v2320_v27  ;;  %v2392_v15 = vld [vmem:[#allocation5 + $0x24c] ss:$16 sps:$4 sm:$0xff]   ;;  %v2387_v16 = vld [vmem:[#allocation5 + $0x240] ss:$16 sps:$4 sm:$0xff]   ;;  %v2390_v17 = vld [vmem:[#allocation5 + $0x248] ss:$16 sps:$4 sm:$0xff]  }
  0x53   :  { %1272 = vmatprep.subr.bf16.mxu0 %v2321_v28  ;;  %1444 = vmatprep.subr.bf16.mxu1 %v2323_v29  ;;  %v2395_v18 = vld [vmem:[#allocation5 + $0x264] ss:$16 sps:$4 sm:$0xff]   ;;  %v2398_v19 = vld [vmem:[#allocation5 + $0x26c] ss:$16 sps:$4 sm:$0xff]   ;;  %v2393_v20 = vld [vmem:[#allocation5 + $0x260] ss:$16 sps:$4 sm:$0xff]  }
  0x54   :  { %v2396_v21 = vld [vmem:[#allocation5 + $0x268] ss:$16 sps:$4 sm:$0xff]   ;;  %v2401_v22 = vld [vmem:[#allocation5 + $0x284] ss:$16 sps:$4 sm:$0xff]   ;;  %v2404_v23 = vld [vmem:[#allocation5 + $0x28c] ss:$16 sps:$4 sm:$0xff]  }
  0x55   :  { %v2399_v24 = vld [vmem:[#allocation5 + $0x280] ss:$16 sps:$4 sm:$0xff]   ;;  %v2402_v25 = vld [vmem:[#allocation5 + $0x288] ss:$16 sps:$4 sm:$0xff]   ;;  %v2407_v26 = vld [vmem:[#allocation5 + $0x2a4] ss:$16 sps:$4 sm:$0xff]  }
  0x56   :  { %1273 = vmatpush1.bf16.msra.mxu0 %v2325_v30  ;;  %1445 = vmatpush1.bf16.msra.mxu1 %v2326_v31  ;;  %v2410_v27 = vld [vmem:[#allocation5 + $0x2ac] ss:$16 sps:$4 sm:$0xff]   ;;  %v2405_v28 = vld [vmem:[#allocation5 + $0x2a0] ss:$16 sps:$4 sm:$0xff]   ;;  %v2408_v29 = vld [vmem:[#allocation5 + $0x2a8] ss:$16 sps:$4 sm:$0xff]  }
  0x57   :  { %1274 = vmatprep.subr.bf16.mxu0 %v2327_v32  ;;  %1446 = vmatprep.subr.bf16.mxu1 %v2329_v33  ;;  %v2413_v30 = vld [vmem:[#allocation5 + $0x2c4] ss:$16 sps:$4 sm:$0xff]   ;;  %v2416_v31 = vld [vmem:[#allocation5 + $0x2cc] ss:$16 sps:$4 sm:$0xff]   ;;  %v2429_v47 = vld [vmem:[#allocation5 + $0x320] ss:$16 sps:$4 sm:$0xff]  }
  0x58   :  { %v60_v32 = vld [vmem:[#allocation2 + $0x18] sm:$0xff]  ;;  %v67_v33 = vld [vmem:[#allocation2 + $0x50] sm:$0xff]  ;;  %s2671_s26 = scalar_lea.vmem %s1956_s25, 256 }
  0x59   :  { %v2434_v46 = vld [vmem:[#allocation5 + $0x32c] ss:$16 sps:$4 sm:$0xff]   ;;  %v2462_v4 = vld [vmem:[#allocation5 + $0x3c8] ss:$16 sps:$4 sm:$0xff]   ;;  %v2467_v5 = vld [vmem:[#allocation5 + $0x3e4] ss:$16 sps:$4 sm:$0xff]   ;;  %p2672_p10 = scmp.ne.s32.totalorder %s1956_s25, %s2671_s26  ;;  %p2677_p12 = scmp.lt.s32.totalorder %s2671_s26, %s2671_s26 }
  0x5a   :  { %1275 = vmatpush1.bf16.msra.mxu0 %v2331_v34  ;;  %1447 = vmatpush1.bf16.msra.mxu1 %v2332_v35  ;;  %v2411_v34 = vld [vmem:[#allocation5 + $0x2c0] ss:$16 sps:$4 sm:$0xff]   ;;  %v2414_v35 = vld [vmem:[#allocation5 + $0x2c8] ss:$16 sps:$4 sm:$0xff]   ;;  %v2440_v50 = vld [vmem:[#allocation5 + $0x34c] ss:$16 sps:$4 sm:$0xff]  }
  0x5b   :  { %1276 = vmatprep.subr.bf16.mxu0 %v2333_v36  ;;  %1448 = vmatprep.subr.bf16.mxu1 %v2335_v37  ;;  %v74_v36 = vpack.c.bf16 %v67_v33, %v60_v32  ;;  %v2419_v37 = vld [vmem:[#allocation5 + $0x2e4] ss:$16 sps:$4 sm:$0xff]   ;;  %v2500_v32 = vld [vmem:[#allocation5 + $0x48c] ss:$16 sps:$4 sm:$0xff]   ;;  %v2495_v33 = vld [vmem:[#allocation5 + $0x480] ss:$16 sps:$4 sm:$0xff]   ;;  %p2678_p13 = por %p2677_p12, %p2676_p11 }
  0x5d   :  { %p2679_p0 = pnand %p2678_p13, %p2672_p10 }
  0x5e   :  { %1277 = vmatpush1.bf16.msra.mxu0 %v2337_v38  ;;  %1449 = vmatpush1.bf16.msra.mxu1 %v2338_v39  ;;  %v2422_v38 = vld [vmem:[#allocation5 + $0x2ec] ss:$16 sps:$4 sm:$0xff]   ;;  %v2417_v39 = vld [vmem:[#allocation5 + $0x2e0] ss:$16 sps:$4 sm:$0xff]  }
  0x5f   :  { %1278 = vmatprep.subr.bf16.mxu0 %v2339_v40  ;;  %1450 = vmatprep.subr.bf16.mxu1 %v2341_v41  ;;  %v2420_v40 = vld [vmem:[#allocation5 + $0x2e8] ss:$16 sps:$4 sm:$0xff]   ;;  %v2425_v41 = vld [vmem:[#allocation5 + $0x304] ss:$16 sps:$4 sm:$0xff]  }
  0x62   :  { %1279 = vmatpush1.bf16.msra.mxu0 %v2343_v42  ;;  %1451 = vmatpush1.bf16.msra.mxu1 %v2344_v43  ;;  %v2428_v42 = vld [vmem:[#allocation5 + $0x30c] ss:$16 sps:$4 sm:$0xff]   ;;  %v2423_v43 = vld [vmem:[#allocation5 + $0x300] ss:$16 sps:$4 sm:$0xff]  }
  0x63   :  { %1280 = vmatprep.subr.bf16.mxu0 %v2345_v44  ;;  %1452 = vmatprep.subr.bf16.mxu1 %v2347_v45  ;;  %v2426_v44 = vld [vmem:[#allocation5 + $0x308] ss:$16 sps:$4 sm:$0xff]   ;;  %v2431_v45 = vld [vmem:[#allocation5 + $0x324] ss:$16 sps:$4 sm:$0xff]  }
  0x66   :  { %1281 = vmatpush1.bf16.msra.mxu0 %v2349_v48  ;;  %1453 = vmatpush1.bf16.msra.mxu1 %v2350_v49  ;;  %v2432_v48 = vld [vmem:[#allocation5 + $0x328] ss:$16 sps:$4 sm:$0xff]   ;;  %v2437_v49 = vld [vmem:[#allocation5 + $0x344] ss:$16 sps:$4 sm:$0xff]  }
  0x67   :  { %1282 = vmatprep.subr.bf16.mxu0 %v2351_v51  ;;  %1454 = vmatprep.subr.bf16.mxu1 %v2353_v52  ;;  %v2435_v51 = vld [vmem:[#allocation5 + $0x340] ss:$16 sps:$4 sm:$0xff]   ;;  %v2438_v52 = vld [vmem:[#allocation5 + $0x348] ss:$16 sps:$4 sm:$0xff]  }
  0x6a   :  { %1283 = vmatpush1.bf16.msra.mxu0 %v2355_v53  ;;  %1455 = vmatpush1.bf16.msra.mxu1 %v2356_v54  ;;  %v2443_v53 = vld [vmem:[#allocation5 + $0x364] ss:$16 sps:$4 sm:$0xff]   ;;  %v2446_v54 = vld [vmem:[#allocation5 + $0x36c] ss:$16 sps:$4 sm:$0xff]  }
  0x6b   :  { %1284 = vmatprep.subr.bf16.mxu0 %v2357_v55  ;;  %1456 = vmatprep.subr.bf16.mxu1 %v2359_v56  ;;  %v2441_v55 = vld [vmem:[#allocation5 + $0x360] ss:$16 sps:$4 sm:$0xff]   ;;  %v2444_v56 = vld [vmem:[#allocation5 + $0x368] ss:$16 sps:$4 sm:$0xff]  }
  0x6e   :  { %1285 = vmatpush1.bf16.msra.mxu0 %v2361_v57  ;;  %1457 = vmatpush1.bf16.msra.mxu1 %v2362_v58  ;;  %v2449_v57 = vld [vmem:[#allocation5 + $0x384] ss:$16 sps:$4 sm:$0xff]   ;;  %v2452_v58 = vld [vmem:[#allocation5 + $0x38c] ss:$16 sps:$4 sm:$0xff]  }
  0x6f   :  { %1286 = vmatprep.subr.bf16.mxu0 %v2363_v59  ;;  %1458 = vmatprep.subr.bf16.mxu1 %v2365_v60  ;;  %v2447_v59 = vld [vmem:[#allocation5 + $0x380] ss:$16 sps:$4 sm:$0xff]   ;;  %v2450_v60 = vld [vmem:[#allocation5 + $0x388] ss:$16 sps:$4 sm:$0xff]  }
  0x72   :  { %1287 = vmatpush1.bf16.msra.mxu0 %v2367_v61  ;;  %1459 = vmatpush1.bf16.msra.mxu1 %v2368_v62  ;;  %v2455_v61 = vld [vmem:[#allocation5 + $0x3a4] ss:$16 sps:$4 sm:$0xff]   ;;  %v2458_v62 = vld [vmem:[#allocation5 + $0x3ac] ss:$16 sps:$4 sm:$0xff]  }
  0x73   :  { %1288 = vmatprep.subr.bf16.mxu0 %v2369_v63  ;;  %1460 = vmatprep.subr.bf16.mxu1 %v2371_v0  ;;  %v2453_v63 = vld [vmem:[#allocation5 + $0x3a0] ss:$16 sps:$4 sm:$0xff]   ;;  %v2456_v0 = vld [vmem:[#allocation5 + $0x3a8] ss:$16 sps:$4 sm:$0xff]  }
  0x76   :  { %1289 = vmatpush1.bf16.msra.mxu0 %v2373_v1  ;;  %1461 = vmatpush1.bf16.msra.mxu1 %v2374_v2  ;;  %v2461_v1 = vld [vmem:[#allocation5 + $0x3c4] ss:$16 sps:$4 sm:$0xff]   ;;  %v2464_v2 = vld [vmem:[#allocation5 + $0x3cc] ss:$16 sps:$4 sm:$0xff]  }
  0x77   :  { %1301 = vmatprep.subr.bf16.mxu0 %v2377_v3  ;;  %1473 = vmatprep.subr.bf16.mxu1 %v2380_v6  ;;  %v2459_v3 = vld [vmem:[#allocation5 + $0x3c0] ss:$16 sps:$4 sm:$0xff]   ;;  %v2470_v6 = vld [vmem:[#allocation5 + $0x3ec] ss:$16 sps:$4 sm:$0xff]  }
  0x79   :  { %1291 = vmatmul.mubr.bf16.vlgmr.msra.gmra.mrb[0].mxu0 %v71_v9  ;;  %1463 = vmatmul.mubr.bf16.vlgmr.msra.gmra.mrb[0].mxu1 %v71_v9  ;;  %v2473_v9 = vld [vmem:[#allocation5 + $0x404] ss:$16 sps:$4 sm:$0xff]  }
  0x7a   :  { %1302 = vmatpush1.bf16.msra.mxu0 %v2375_v7  ;;  %1474 = vmatpush1.bf16.msra.mxu1 %v2378_v8  ;;  %v2465_v7 = vld [vmem:[#allocation5 + $0x3e0] ss:$16 sps:$4 sm:$0xff]   ;;  %v2468_v8 = vld [vmem:[#allocation5 + $0x3e8] ss:$16 sps:$4 sm:$0xff]  }
  0x7b   :  { %1303 = vmatprep.subr.bf16.mxu0 %v2383_v10  ;;  %1475 = vmatprep.subr.bf16.mxu1 %v2386_v11  ;;  %v59_v10 = vld [vmem:[#allocation2 + $0x10] sm:$0xff]  ;;  %v66_v11 = vld [vmem:[#allocation2 + $0x48] sm:$0xff] }
  0x7c   :  { %1333 = vmatprep.mubr.bf16.mxu0 %v74_v36  ;;  %1505 = vmatprep.mubr.bf16.mxu1 %v74_v36  ;;  %v2506_v36 = vld [vmem:[#allocation5 + $0x4ac] ss:$16 sps:$4 sm:$0xff]  }
  0x7e   :  { %1304 = vmatpush1.bf16.msra.mxu0 %v2381_v12  ;;  %1476 = vmatpush1.bf16.msra.mxu1 %v2384_v13  ;;  %v2476_v12 = vld [vmem:[#allocation5 + $0x40c] ss:$16 sps:$4 sm:$0xff]   ;;  %v2471_v13 = vld [vmem:[#allocation5 + $0x400] ss:$16 sps:$4 sm:$0xff]  }
  0x7f   :  { %1305 = vmatprep.subr.bf16.mxu0 %v2389_v14  ;;  %1477 = vmatprep.subr.bf16.mxu1 %v2392_v15  ;;  %v2474_v14 = vld [vmem:[#allocation5 + $0x408] ss:$16 sps:$4 sm:$0xff]   ;;  %v73_v15 = vpack.c.bf16 %v66_v11, %v59_v10  ;;  %v2563_v11 = vld [vmem:[#allocation5 + $0x5e4] ss:$16 sps:$4 sm:$0xff]  }
  0x80   :  { %v2558_v10 = vld [vmem:[#allocation5 + $0x5c8] ss:$16 sps:$4 sm:$0xff]  }
  0x82   :  { %1306 = vmatpush1.bf16.msra.mxu0 %v2387_v16  ;;  %1478 = vmatpush1.bf16.msra.mxu1 %v2390_v17  ;;  %v2479_v16 = vld [vmem:[#allocation5 + $0x424] ss:$16 sps:$4 sm:$0xff]   ;;  %v2482_v17 = vld [vmem:[#allocation5 + $0x42c] ss:$16 sps:$4 sm:$0xff]  }
  0x83   :  { %1307 = vmatprep.subr.bf16.mxu0 %v2395_v18  ;;  %1479 = vmatprep.subr.bf16.mxu1 %v2398_v19  ;;  %v62_v18 = vld [vmem:[#allocation2 + $0x28] sm:$0xff]  ;;  %v2477_v19 = vld [vmem:[#allocation5 + $0x420] ss:$16 sps:$4 sm:$0xff]  }
  0x86   :  { %1308 = vmatpush1.bf16.msra.mxu0 %v2393_v20  ;;  %1480 = vmatpush1.bf16.msra.mxu1 %v2396_v21  ;;  %v2480_v20 = vld [vmem:[#allocation5 + $0x428] ss:$16 sps:$4 sm:$0xff]   ;;  %v69_v21 = vld [vmem:[#allocation2 + $0x60] sm:$0xff] }
  0x87   :  { %1309 = vmatprep.subr.bf16.mxu0 %v2401_v22  ;;  %1481 = vmatprep.subr.bf16.mxu1 %v2404_v23  ;;  %v2485_v22 = vld [vmem:[#allocation5 + $0x444] ss:$16 sps:$4 sm:$0xff]   ;;  %v76_v23 = vpack.c.bf16 %v69_v21, %v62_v18  ;;  %v2572_v18 = vld [vmem:[#allocation5 + $0x60c] ss:$16 sps:$4 sm:$0xff]   ;;  %v2570_v21 = vld [vmem:[#allocation5 + $0x608] ss:$16 sps:$4 sm:$0xff]  }
  0x8a   :  { %1310 = vmatpush1.bf16.msra.mxu0 %v2399_v24  ;;  %1482 = vmatpush1.bf16.msra.mxu1 %v2402_v25  ;;  %v2488_v24 = vld [vmem:[#allocation5 + $0x44c] ss:$16 sps:$4 sm:$0xff]   ;;  %v2483_v25 = vld [vmem:[#allocation5 + $0x440] ss:$16 sps:$4 sm:$0xff]  }
  0x8b   :  { %1311 = vmatprep.subr.bf16.mxu0 %v2407_v26  ;;  %1483 = vmatprep.subr.bf16.mxu1 %v2410_v27  ;;  %v2486_v26 = vld [vmem:[#allocation5 + $0x448] ss:$16 sps:$4 sm:$0xff]   ;;  %v2491_v27 = vld [vmem:[#allocation5 + $0x464] ss:$16 sps:$4 sm:$0xff]  }
  0x8e   :  { %1312 = vmatpush1.bf16.msra.mxu0 %v2405_v28  ;;  %1484 = vmatpush1.bf16.msra.mxu1 %v2408_v29  ;;  %v2494_v28 = vld [vmem:[#allocation5 + $0x46c] ss:$16 sps:$4 sm:$0xff]   ;;  %v2489_v29 = vld [vmem:[#allocation5 + $0x460] ss:$16 sps:$4 sm:$0xff]  }
  0x8f   :  { %1313 = vmatprep.subr.bf16.mxu0 %v2413_v30  ;;  %1485 = vmatprep.subr.bf16.mxu1 %v2416_v31  ;;  %v2492_v30 = vld [vmem:[#allocation5 + $0x468] ss:$16 sps:$4 sm:$0xff]   ;;  %v2497_v31 = vld [vmem:[#allocation5 + $0x484] ss:$16 sps:$4 sm:$0xff]  }
  0x92   :  { %1314 = vmatpush1.bf16.msra.mxu0 %v2411_v34  ;;  %1486 = vmatpush1.bf16.msra.mxu1 %v2414_v35  ;;  %v2498_v34 = vld [vmem:[#allocation5 + $0x488] ss:$16 sps:$4 sm:$0xff]   ;;  %v2503_v35 = vld [vmem:[#allocation5 + $0x4a4] ss:$16 sps:$4 sm:$0xff]  }
  0x93   :  { %1315 = vmatprep.subr.bf16.mxu0 %v2419_v37  ;;  %1487 = vmatprep.subr.bf16.mxu1 %v2422_v38  ;;  %v2501_v37 = vld [vmem:[#allocation5 + $0x4a0] ss:$16 sps:$4 sm:$0xff]   ;;  %v2504_v38 = vld [vmem:[#allocation5 + $0x4a8] ss:$16 sps:$4 sm:$0xff]  }
  0x96   :  { %1316 = vmatpush1.bf16.msra.mxu0 %v2417_v39  ;;  %1488 = vmatpush1.bf16.msra.mxu1 %v2420_v40  ;;  %v2509_v39 = vld [vmem:[#allocation5 + $0x4c4] ss:$16 sps:$4 sm:$0xff]   ;;  %v2512_v40 = vld [vmem:[#allocation5 + $0x4cc] ss:$16 sps:$4 sm:$0xff]  }
  0x97   :  { %1317 = vmatprep.subr.bf16.mxu0 %v2425_v41  ;;  %1489 = vmatprep.subr.bf16.mxu1 %v2428_v42  ;;  %v2507_v41 = vld [vmem:[#allocation5 + $0x4c0] ss:$16 sps:$4 sm:$0xff]   ;;  %v2510_v42 = vld [vmem:[#allocation5 + $0x4c8] ss:$16 sps:$4 sm:$0xff]  }
  0x9a   :  { %1318 = vmatpush1.bf16.msra.mxu0 %v2423_v43  ;;  %1490 = vmatpush1.bf16.msra.mxu1 %v2426_v44  ;;  %v2515_v43 = vld [vmem:[#allocation5 + $0x4e4] ss:$16 sps:$4 sm:$0xff]   ;;  %v2518_v44 = vld [vmem:[#allocation5 + $0x4ec] ss:$16 sps:$4 sm:$0xff]  }
  0x9b   :  { %1319 = vmatprep.subr.bf16.mxu0 %v2431_v45  ;;  %1491 = vmatprep.subr.bf16.mxu1 %v2434_v46  ;;  %v2513_v45 = vld [vmem:[#allocation5 + $0x4e0] ss:$16 sps:$4 sm:$0xff]   ;;  %v2516_v46 = vld [vmem:[#allocation5 + $0x4e8] ss:$16 sps:$4 sm:$0xff]  }
  0x9e   :  { %1320 = vmatpush1.bf16.msra.mxu0 %v2429_v47  ;;  %1492 = vmatpush1.bf16.msra.mxu1 %v2432_v48  ;;  %v2521_v47 = vld [vmem:[#allocation5 + $0x504] ss:$16 sps:$4 sm:$0xff]   ;;  %v2524_v48 = vld [vmem:[#allocation5 + $0x50c] ss:$16 sps:$4 sm:$0xff]  }
  0x9f   :  { %1321 = vmatprep.subr.bf16.mxu0 %v2437_v49  ;;  %1493 = vmatprep.subr.bf16.mxu1 %v2440_v50  ;;  %v2519_v49 = vld [vmem:[#allocation5 + $0x500] ss:$16 sps:$4 sm:$0xff]   ;;  %v2522_v50 = vld [vmem:[#allocation5 + $0x508] ss:$16 sps:$4 sm:$0xff]  }
  0xa2   :  { %1322 = vmatpush1.bf16.msra.mxu0 %v2435_v51  ;;  %1494 = vmatpush1.bf16.msra.mxu1 %v2438_v52  ;;  %v2527_v51 = vld [vmem:[#allocation5 + $0x524] ss:$16 sps:$4 sm:$0xff]   ;;  %v2530_v52 = vld [vmem:[#allocation5 + $0x52c] ss:$16 sps:$4 sm:$0xff]  }
  0xa3   :  { %1323 = vmatprep.subr.bf16.mxu0 %v2443_v53  ;;  %1495 = vmatprep.subr.bf16.mxu1 %v2446_v54  ;;  %v2525_v53 = vld [vmem:[#allocation5 + $0x520] ss:$16 sps:$4 sm:$0xff]   ;;  %v2528_v54 = vld [vmem:[#allocation5 + $0x528] ss:$16 sps:$4 sm:$0xff]  }
  0xa6   :  { %1324 = vmatpush1.bf16.msra.mxu0 %v2441_v55  ;;  %1496 = vmatpush1.bf16.msra.mxu1 %v2444_v56  ;;  %v2533_v55 = vld [vmem:[#allocation5 + $0x544] ss:$16 sps:$4 sm:$0xff]   ;;  %v2536_v56 = vld [vmem:[#allocation5 + $0x54c] ss:$16 sps:$4 sm:$0xff]  }
  0xa7   :  { %1325 = vmatprep.subr.bf16.mxu0 %v2449_v57  ;;  %1497 = vmatprep.subr.bf16.mxu1 %v2452_v58  ;;  %v2531_v57 = vld [vmem:[#allocation5 + $0x540] ss:$16 sps:$4 sm:$0xff]   ;;  %v2534_v58 = vld [vmem:[#allocation5 + $0x548] ss:$16 sps:$4 sm:$0xff]  }
  0xaa   :  { %1326 = vmatpush1.bf16.msra.mxu0 %v2447_v59  ;;  %1498 = vmatpush1.bf16.msra.mxu1 %v2450_v60  ;;  %v2539_v59 = vld [vmem:[#allocation5 + $0x564] ss:$16 sps:$4 sm:$0xff]   ;;  %v2542_v60 = vld [vmem:[#allocation5 + $0x56c] ss:$16 sps:$4 sm:$0xff]  }
  0xab   :  { %1327 = vmatprep.subr.bf16.mxu0 %v2455_v61  ;;  %1499 = vmatprep.subr.bf16.mxu1 %v2458_v62  ;;  %v2537_v61 = vld [vmem:[#allocation5 + $0x560] ss:$16 sps:$4 sm:$0xff]   ;;  %v2540_v62 = vld [vmem:[#allocation5 + $0x568] ss:$16 sps:$4 sm:$0xff]  }
  0xae   :  { %1328 = vmatpush1.bf16.msra.mxu0 %v2453_v63  ;;  %1500 = vmatpush1.bf16.msra.mxu1 %v2456_v0  ;;  %v2545_v63 = vld [vmem:[#allocation5 + $0x584] ss:$16 sps:$4 sm:$0xff]   ;;  %v2548_v0 = vld [vmem:[#allocation5 + $0x58c] ss:$16 sps:$4 sm:$0xff]  }
  0xaf   :  { %1329 = vmatprep.subr.bf16.mxu0 %v2461_v1  ;;  %1501 = vmatprep.subr.bf16.mxu1 %v2464_v2  ;;  %v2543_v1 = vld [vmem:[#allocation5 + $0x580] ss:$16 sps:$4 sm:$0xff]   ;;  %v2546_v2 = vld [vmem:[#allocation5 + $0x588] ss:$16 sps:$4 sm:$0xff]  }
  0xb2   :  { %1330 = vmatpush1.bf16.msra.mxu0 %v2459_v3  ;;  %1502 = vmatpush1.bf16.msra.mxu1 %v2462_v4  ;;  %v2551_v3 = vld [vmem:[#allocation5 + $0x5a4] ss:$16 sps:$4 sm:$0xff]   ;;  %v2554_v4 = vld [vmem:[#allocation5 + $0x5ac] ss:$16 sps:$4 sm:$0xff]  }
  0xb3   :  { %1331 = vmatprep.subr.bf16.mxu0 %v2467_v5  ;;  %1503 = vmatprep.subr.bf16.mxu1 %v2470_v6  ;;  %v2549_v5 = vld [vmem:[#allocation5 + $0x5a0] ss:$16 sps:$4 sm:$0xff]   ;;  %v2552_v6 = vld [vmem:[#allocation5 + $0x5a8] ss:$16 sps:$4 sm:$0xff]  }
  0xb6   :  { %1332 = vmatpush1.bf16.msra.mxu0 %v2465_v7  ;;  %1504 = vmatpush1.bf16.msra.mxu1 %v2468_v8  ;;  %v2557_v7 = vld [vmem:[#allocation5 + $0x5c4] ss:$16 sps:$4 sm:$0xff]   ;;  %v2560_v8 = vld [vmem:[#allocation5 + $0x5cc] ss:$16 sps:$4 sm:$0xff]  }
  0xb7   :  { %1344 = vmatprep.subr.bf16.mxu0 %v2473_v9  ;;  %1516 = vmatprep.subr.bf16.mxu1 %v2476_v12  ;;  %v2555_v9 = vld [vmem:[#allocation5 + $0x5c0] ss:$16 sps:$4 sm:$0xff]   ;;  %v2566_v12 = vld [vmem:[#allocation5 + $0x5ec] ss:$16 sps:$4 sm:$0xff]  }
  0xb9   :  { %1334 = vmatmul.mubr.bf16.vlgmr.msra.gmra.mrb[0].mxu0 %v73_v15  ;;  %1506 = vmatmul.mubr.bf16.vlgmr.msra.gmra.mrb[0].mxu1 %v73_v15  ;;  %v61_v15 = vld [vmem:[#allocation2 + $0x20] sm:$0xff] }
  0xba   :  { %1345 = vmatpush1.bf16.msra.mxu0 %v2471_v13  ;;  %1517 = vmatpush1.bf16.msra.mxu1 %v2474_v14  ;;  %v2561_v13 = vld [vmem:[#allocation5 + $0x5e0] ss:$16 sps:$4 sm:$0xff]   ;;  %v2564_v14 = vld [vmem:[#allocation5 + $0x5e8] ss:$16 sps:$4 sm:$0xff]  }
  0xbb   :  { %1346 = vmatprep.subr.bf16.mxu0 %v2479_v16  ;;  %1518 = vmatprep.subr.bf16.mxu1 %v2482_v17  ;;  %v68_v16 = vld [vmem:[#allocation2 + $0x58] sm:$0xff]  ;;  %v2569_v17 = vld [vmem:[#allocation5 + $0x604] ss:$16 sps:$4 sm:$0xff]  }
  0xbc   :  { %1376 = vmatprep.mubr.bf16.mxu0 %v76_v23  ;;  %1548 = vmatprep.mubr.bf16.mxu1 %v76_v23  ;;  %v2574_v23 = vld [vmem:[#allocation7 + $0xc0] sm:$0xff]  }
  0xbe   :  { %1347 = vmatpush1.bf16.msra.mxu0 %v2477_v19  ;;  %1519 = vmatpush1.bf16.msra.mxu1 %v2480_v20  ;;  %v75_v19 = vpack.c.bf16 %v68_v16, %v61_v15  ;;  %v2567_v20 = vld [vmem:[#allocation5 + $0x600] ss:$16 sps:$4 sm:$0xff]  }
  0xbf   :  { %1348 = vmatprep.subr.bf16.mxu0 %v2485_v22  ;;  %1520 = vmatprep.subr.bf16.mxu1 %v2488_v24  ;;  %v2573_v22 = vld [vmem:[#allocation7 + $0x40] sm:$0xff]   ;;  %v2708_v24 = vmov 0  }
  0xc2   :  { %1349 = vmatpush1.bf16.msra.mxu0 %v2483_v25  ;;  %1521 = vmatpush1.bf16.msra.mxu1 %v2486_v26  ;;  %v63_v25 = vld [vmem:[#allocation2 + $0x30] sm:$0xff]  ;;  %v70_v26 = vld [vmem:[#allocation2 + $0x68] sm:$0xff] }
  0xc3   :  { %1350 = vmatprep.subr.bf16.mxu0 %v2491_v27  ;;  %1522 = vmatprep.subr.bf16.mxu1 %v2494_v28  ;;  %v77_v27 = vpack.c.bf16 %v70_v26, %v63_v25  ;;  %v2575_v28 = vld [vmem:[#allocation7] sm:$0xff]  }
  0xc6   :  { %1351 = vmatpush1.bf16.msra.mxu0 %v2489_v29  ;;  %1523 = vmatpush1.bf16.msra.mxu1 %v2492_v30  ;;  %v2576_v29 = vld [vmem:[#allocation7 + $0x80] sm:$0xff]   ;;  %v2577_v30 = vld [vmem:[#allocation7 + $0x48] sm:$0xff]  }
  0xc7   :  { %1352 = vmatprep.subr.bf16.mxu0 %v2497_v31  ;;  %1524 = vmatprep.subr.bf16.mxu1 %v2500_v32  ;;  %v2578_v31 = vld [vmem:[#allocation7 + $0xc8] sm:$0xff]  }
  0xc8   :  { %v2579_v32 = vld [vmem:[#allocation7 + $0x8] sm:$0xff]  }
  0xca   :  { %1353 = vmatpush1.bf16.msra.mxu0 %v2495_v33  ;;  %1525 = vmatpush1.bf16.msra.mxu1 %v2498_v34  ;;  %v2580_v33 = vld [vmem:[#allocation7 + $0x88] sm:$0xff]   ;;  %v2581_v34 = vld [vmem:[#allocation7 + $0x50] sm:$0xff]  }
  0xcb   :  { %1354 = vmatprep.subr.bf16.mxu0 %v2503_v35  ;;  %1526 = vmatprep.subr.bf16.mxu1 %v2506_v36  ;;  %v2582_v35 = vld [vmem:[#allocation7 + $0xd0] sm:$0xff]  }
  0xcc   :  { %v2583_v36 = vld [vmem:[#allocation7 + $0x10] sm:$0xff]  }
  0xce   :  { %1355 = vmatpush1.bf16.msra.mxu0 %v2501_v37  ;;  %1527 = vmatpush1.bf16.msra.mxu1 %v2504_v38  ;;  %v2584_v37 = vld [vmem:[#allocation7 + $0x90] sm:$0xff]   ;;  %v2585_v38 = vld [vmem:[#allocation7 + $0x58] sm:$0xff]  }
  0xcf   :  { %1356 = vmatprep.subr.bf16.mxu0 %v2509_v39  ;;  %1528 = vmatprep.subr.bf16.mxu1 %v2512_v40  ;;  %v2586_v39 = vld [vmem:[#allocation7 + $0xd8] sm:$0xff]  }
  0xd0   :  { %v2587_v40 = vld [vmem:[#allocation7 + $0x18] sm:$0xff]  }
  0xd2   :  { %1357 = vmatpush1.bf16.msra.mxu0 %v2507_v41  ;;  %1529 = vmatpush1.bf16.msra.mxu1 %v2510_v42  ;;  %v2588_v41 = vld [vmem:[#allocation7 + $0x98] sm:$0xff]   ;;  %v2589_v42 = vld [vmem:[#allocation7 + $0x60] sm:$0xff]  }
  0xd3   :  { %1358 = vmatprep.subr.bf16.mxu0 %v2515_v43  ;;  %1530 = vmatprep.subr.bf16.mxu1 %v2518_v44  ;;  %v2590_v43 = vld [vmem:[#allocation7 + $0xe0] sm:$0xff]  }
  0xd4   :  { %v2591_v44 = vld [vmem:[#allocation7 + $0x20] sm:$0xff]  }
  0xd6   :  { %1359 = vmatpush1.bf16.msra.mxu0 %v2513_v45  ;;  %1531 = vmatpush1.bf16.msra.mxu1 %v2516_v46  ;;  %v2592_v45 = vld [vmem:[#allocation7 + $0xa0] sm:$0xff]   ;;  %v2593_v46 = vld [vmem:[#allocation7 + $0x68] sm:$0xff]  }
  0xd7   :  { %1360 = vmatprep.subr.bf16.mxu0 %v2521_v47  ;;  %1532 = vmatprep.subr.bf16.mxu1 %v2524_v48  ;;  %v2594_v47 = vld [vmem:[#allocation7 + $0xe8] sm:$0xff]  }
  0xd8   :  { %v2595_v48 = vld [vmem:[#allocation7 + $0x28] sm:$0xff]  }
  0xda   :  { %1361 = vmatpush1.bf16.msra.mxu0 %v2519_v49  ;;  %1533 = vmatpush1.bf16.msra.mxu1 %v2522_v50  ;;  %v2596_v49 = vld [vmem:[#allocation7 + $0xa8] sm:$0xff]   ;;  %v2597_v50 = vld [vmem:[#allocation7 + $0x70] sm:$0xff]  }
  0xdb   :  { %1362 = vmatprep.subr.bf16.mxu0 %v2527_v51  ;;  %1534 = vmatprep.subr.bf16.mxu1 %v2530_v52  ;;  %v2598_v51 = vld [vmem:[#allocation7 + $0xf0] sm:$0xff]  }
  0xdc   :  { %v2599_v52 = vld [vmem:[#allocation7 + $0x30] sm:$0xff]  }
  0xde   :  { %1363 = vmatpush1.bf16.msra.mxu0 %v2525_v53  ;;  %1535 = vmatpush1.bf16.msra.mxu1 %v2528_v54  ;;  %v2600_v53 = vld [vmem:[#allocation7 + $0xb0] sm:$0xff]   ;;  %v2601_v54 = vld [vmem:[#allocation7 + $0x78] sm:$0xff]  }
  0xdf   :  { %1364 = vmatprep.subr.bf16.mxu0 %v2533_v55  ;;  %1536 = vmatprep.subr.bf16.mxu1 %v2536_v56  ;;  %v2602_v55 = vld [vmem:[#allocation7 + $0xf8] sm:$0xff]  }
  0xe0   :  { %v2603_v56 = vld [vmem:[#allocation7 + $0x38] sm:$0xff]  }
  0xe2   :  { %1365 = vmatpush1.bf16.msra.mxu0 %v2531_v57  ;;  %1537 = vmatpush1.bf16.msra.mxu1 %v2534_v58  ;;  %v2604_v57 = vld [vmem:[#allocation7 + $0xb8] sm:$0xff]  }
  0xe3   :  { %1366 = vmatprep.subr.bf16.mxu0 %v2539_v59  ;;  %1538 = vmatprep.subr.bf16.mxu1 %v2542_v60 }
  0xe6   :  { %1367 = vmatpush1.bf16.msra.mxu0 %v2537_v61  ;;  %1539 = vmatpush1.bf16.msra.mxu1 %v2540_v62 }
  0xe7   :  { %1368 = vmatprep.subr.bf16.mxu0 %v2545_v63  ;;  %1540 = vmatprep.subr.bf16.mxu1 %v2548_v0 }
  0xea   :  { %1369 = vmatpush1.bf16.msra.mxu0 %v2543_v1  ;;  %1541 = vmatpush1.bf16.msra.mxu1 %v2546_v2 }
  0xeb   :  { %1370 = vmatprep.subr.bf16.mxu0 %v2551_v3  ;;  %1542 = vmatprep.subr.bf16.mxu1 %v2554_v4 }
  0xee   :  { %1371 = vmatpush1.bf16.msra.mxu0 %v2549_v5  ;;  %1543 = vmatpush1.bf16.msra.mxu1 %v2552_v6 }
  0xef   :  { %1372 = vmatprep.subr.bf16.mxu0 %v2557_v7  ;;  %1544 = vmatprep.subr.bf16.mxu1 %v2560_v8 }
  0xf2   :  { %1373 = vmatpush1.bf16.msra.mxu0 %v2555_v9  ;;  %1545 = vmatpush1.bf16.msra.mxu1 %v2558_v10 }
  0xf3   :  { %1374 = vmatprep.subr.bf16.mxu0 %v2563_v11  ;;  %1546 = vmatprep.subr.bf16.mxu1 %v2566_v12 }
  0xf6   :  { %1375 = vmatpush1.bf16.msra.mxu0 %v2561_v13  ;;  %1547 = vmatpush1.bf16.msra.mxu1 %v2564_v14 }
  0xf7   :  { %1387 = vmatprep.subr.bf16.mxu0 %v2569_v17  ;;  %1559 = vmatprep.subr.bf16.mxu1 %v2572_v18 }
  0xf9   :  { %1377 = vmatmul.mubr.bf16.vlgmr.msra.gmra.mrb[0].mxu0 %v75_v19  ;;  %1549 = vmatmul.mubr.bf16.vlgmr.msra.gmra.mrb[0].mxu1 %v75_v19 }
  0xfa   :  { %1388 = vmatpush1.bf16.msra.mxu0 %v2567_v20  ;;  %1560 = vmatpush1.bf16.msra.mxu1 %v2570_v21 }
  0xfb   :  { %1419 = vmatprep.mubr.bf16.mxu0 %v2708_v24  ;;  %1591 = vmatprep.mubr.bf16.mxu1 %v2708_v24 }
  0xfc   :  { %2198 = vmatprep.subr.bf16.mxu0 %v2573_v22  ;;  %2220 = vmatprep.subr.bf16.mxu1 %v2574_v23 }
 0x105   :  { %2164 = vmatmul.mubr.msk.bf16.vlgmr.msra.gmra.mrb[0].mxu0 %vm1254_vm0, %v77_v27  ;;  %2165 = vmatmul.mubr.msk.bf16.vlgmr.msra.gmra.mrb[0].mxu1 %vm1254_vm0, %v77_v27 }
 0x106   :  { %2199 = vmatpush3.bf16.msra.mxu0 %v2575_v28  ;;  %2221 = vmatpush3.bf16.msra.mxu1 %v2576_v29 }
 0x107   :  { %2200 = vmatprep.subr.bf16.mxu0 %v2577_v30  ;;  %2222 = vmatprep.subr.bf16.mxu1 %v2578_v31 }
 0x10a   :  { %2201 = vmatpush3.bf16.msra.mxu0 %v2579_v32  ;;  %2223 = vmatpush3.bf16.msra.mxu1 %v2580_v33 }
 0x10b   :  { %2202 = vmatprep.subr.bf16.mxu0 %v2581_v34  ;;  %2224 = vmatprep.subr.bf16.mxu1 %v2582_v35 }
 0x10e   :  { %2203 = vmatpush3.bf16.msra.mxu0 %v2583_v36  ;;  %2225 = vmatpush3.bf16.msra.mxu1 %v2584_v37 }
 0x10f   :  { %2204 = vmatprep.subr.bf16.mxu0 %v2585_v38  ;;  %2226 = vmatprep.subr.bf16.mxu1 %v2586_v39 }
 0x112   :  { %2205 = vmatpush3.bf16.msra.mxu0 %v2587_v40  ;;  %2227 = vmatpush3.bf16.msra.mxu1 %v2588_v41 }
 0x113   :  { %2206 = vmatprep.subr.bf16.mxu0 %v2589_v42  ;;  %2228 = vmatprep.subr.bf16.mxu1 %v2590_v43 }
 0x116   :  { %2207 = vmatpush3.bf16.msra.mxu0 %v2591_v44  ;;  %2229 = vmatpush3.bf16.msra.mxu1 %v2592_v45 }
 0x117   :  { %2208 = vmatprep.subr.bf16.mxu0 %v2593_v46  ;;  %2230 = vmatprep.subr.bf16.mxu1 %v2594_v47 }
 0x11a   :  { %2209 = vmatpush3.bf16.msra.mxu0 %v2595_v48  ;;  %2231 = vmatpush3.bf16.msra.mxu1 %v2596_v49 }
 0x11b   :  { %2210 = vmatprep.subr.bf16.mxu0 %v2597_v50  ;;  %2232 = vmatprep.subr.bf16.mxu1 %v2598_v51 }
 0x11e   :  { %2211 = vmatpush3.bf16.msra.mxu0 %v2599_v52  ;;  %2233 = vmatpush3.bf16.msra.mxu1 %v2600_v53 }
 0x11f   :  { %2212 = vmatprep.subr.bf16.mxu0 %v2601_v54  ;;  %2234 = vmatprep.subr.bf16.mxu1 %v2602_v55 }
 0x122   :  { %2213 = vmatpush3.bf16.msra.mxu0 %v2603_v56  ;;  %2235 = vmatpush3.bf16.msra.mxu1 %v2604_v57 }
 0x1d8   :  { %v1421_v58 = vpop.f32.mrb[0].mxu0  ;;  %v1593_v59 = vpop.f32.mrb[0].mxu1 }
 0x1d9   :  { %v1423_v60 = vpop.f32.mrb[1].mxu0  ;;  %v1595_v61 = vpop.f32.mrb[1].mxu1 }
 0x1da   :  { %v1425_v62 = vpop.f32.mrb[2].mxu0  ;;  %v1597_v63 = vpop.f32.mrb[2].mxu1 }
 0x1db   :  { %v1602_v0 = vpack.c.bf16 %v1425_v62, %v1421_v58  ;;  %v1604_v1 = vpack.c.bf16 %v1597_v63, %v1593_v59  ;;  %v1427_v2 = vpop.f32.mrb[3].mxu0  ;;  %v1599_v3 = vpop.f32.mrb[3].mxu1 }
 0x1dc   :  { %v1603_v4 = vpack.c.bf16 %v1427_v2, %v1423_v60  ;;  %v1605_v5 = vpack.c.bf16 %v1599_v3, %v1595_v61 }
 0x1dd   :  { %v1606_v8 = vmax.bf16 %v2708_v24, %v1602_v0  ;;  %v1608_v9 = vmax.bf16 %v2708_v24, %v1604_v1 }
 0x1de   :  { %v1607_v6 = vmax.bf16 %v2708_v24, %v1603_v4  ;;  %v1609_v7 = vmax.bf16 %v2708_v24, %v1605_v5 }
 0x1e0   :  { %1898 = vmatprep.mubr.bf16.mxu0 %v1607_v6  ;;  %1939 = vmatprep.mubr.bf16.mxu1 %v1609_v7 }
 0x1e1   :  { %1899 = vmatmul.mubr.bf16.vlgmr.msra.gmra.mrb[4].mxu0 %v1606_v8  ;;  %1940 = vmatmul.mubr.bf16.vlgmr.msra.gmra.mrb[4].mxu1 %v1608_v9 }
 0x2b4   :  { %v2214_v10 = vpop.f32.mrb[4].mxu0  ;;  %v2236_v11 = vpop.f32.mrb[4].mxu1 }
 0x2b5   :  { %v2215_v12 = vpop.f32.mrb[5].mxu0  ;;  %v2237_v13 = vpop.f32.mrb[5].mxu1 }
 0x2b6   :  { %v2216_v14 = vadd.f32 %v2215_v12, %v2214_v10  ;;  %v2238_v15 = vadd.f32 %v2237_v13, %v2236_v11  ;;  %v2217_v16 = vpop.f32.mrb[6].mxu0  ;;  %v2239_v17 = vpop.f32.mrb[6].mxu1 }
 0x2b7   :  { %v2218_v18 = vpop.f32.mrb[7].mxu0  ;;  %v2240_v19 = vpop.f32.mrb[7].mxu1 }
 0x2b8   :  { %v1942_v20 = vadd.f32 %v2238_v15, %v2216_v14  ;;  %v2219_v21 = vadd.f32 %v2218_v18, %v2217_v16  ;;  %v2241_v22 = vadd.f32 %v2240_v19, %v2239_v17 }
 0x2ba   :  { %1948 = vst [vmem:[#allocation8] sm:$0xff] %v1942_v20  ;;  %v1945_v23 = vadd.f32 %v2241_v22, %v2219_v21 }
 0x2bc   :  { %1949 = vst [vmem:[#allocation8 + $0x8] sm:$0xff] %v1945_v23 }
 0x2bd   :  { %2682 = shalt.err (!%p2679_p0)
}
 0x2be   :  { %s2683_s29 = scalar_lea.hbm %s2789_s3, 256 }
 0x2bf   :  { %p2684_p1 = scmp.ne.s32.totalorder %s2789_s3, %s2683_s29  ;;  %p2687_p2 = scmp.lt.u32.totalorder %s2683_s29, %s2789_s3 }
 0x2c1   :  { %p2689_p3 = pnand %p2687_p2, %p2684_p1 }
 0x2c3   :  { %2692 = shalt.err (!%p2689_p3)
}
 0x2c4   :  { %s2710_s7 = smov 128   ;;  %s2711_s8 = smov 8  }
 0x2c5   :  { %1961 = dma.vmem_to_hbm [thread:$0]  %s1956_s25, 256, %s2789_s3, [#allocation4], %s2710_s7, %s2710_s7, %s2711_s8  }
 0x2c6   :  { %2697 = dma.done.wait [#allocation4], 256  }
 0x2c7   :  { %2698 = vsyncadd [#allocation4], 4294967040 }
 0x2c8   :  { %1965 = vsyncpa [#allocation3], 1 }
 0x2c9   :  { %1966 = vsyncpa [#allocation6], 1 }
 0x2ca   :  { %1967 = vsyncpa [#allocation4], 1 }

</bundles_post_ra>
